<compile_context>
chip_gen: v7x
topology: tpu7x:2x2x1
jax: 0.10.0
libtpu: 0.0.40
codegen_flags: <defaults>
</compile_context>

<pallas_src>
import functools

import jax
import jax.numpy as jnp
from jax.experimental import pallas as pl
from jax.experimental.pallas import tpu as pltpu

# ----------------------------- model hyper-params (small) -----------------------------
DIM = 32        # `dim`
QK_DIM = 8      # `qk_dim`
V_DIM = 8       # `v_dim`
HEADS = 4       # `heads`
B = 2           # batch
N = 8           # sequence length / n agents

INNER_QK = QK_DIM * HEADS          # 32
INNER_V = V_DIM * HEADS            # 32
SCALE = QK_DIM ** -0.5


# ----------------------------------- Pallas kernel ------------------------------------
def _base_attention_kernel(x_ref, wqkv_ref, wo_ref, bo_ref, out_ref, *attn_refs,
                           heads, qk_dim, v_dim, seq_n, with_attn):
    """One batch-tile (tb batches = tb*seq_n rows) per invocation.

    x_ref    : (TBN, DIM)                      VMEM  tile of x flattened to rows
    wqkv_ref : (H, DIM, 2*qk_dim + v_dim)      VMEM  per-head fused [Wq*scale | Wk | Wv]
    wo_ref   : (H, v_dim, DIM)                 VMEM  per-head slab of to_out[0] weight
    bo_ref   : (1, DIM)                        VMEM  to_out[0] bias
    out_ref  : (TBN, DIM)                      VMEM
    attn_refs[0] (optional): (H, TBN, TBN)     VMEM  per-tile attention probabilities
    """
    tbn = x_ref.shape[0]

    x = x_ref[...].astype(jnp.float32)                                   # (TBN, DIM)
    xb = jnp.broadcast_to(x[None], (heads,) + x.shape)                   # (H, TBN, DIM)

    # Fused per-head projection: one batched MXU pass, heads stay on the leading axis,
    # so no lane<->sublane shuffles are ever needed.  q columns are pre-scaled on host.
    qkv = jnp.einsum('hnd,hdk->hnk', xb, wqkv_ref[...],
                     preferred_element_type=jnp.float32)                 # (H, TBN, 2qk+v)
    q = qkv[..., :qk_dim]
    k = qkv[..., qk_dim:2 * qk_dim]
    v = qkv[..., 2 * qk_dim:2 * qk_dim + v_dim]

    # Scores for every head at once; different batches inside the tile are masked out
    # (block-diagonal validity along the row/col axes).
    s = jnp.einsum('hid,hjd->hij', q, k,
                   preferred_element_type=jnp.float32)                   # (H, TBN, TBN)
    row = jax.lax.broadcasted_iota(jnp.int32, (tbn, tbn), 0)
    col = jax.lax.broadcasted_iota(jnp.int32, (tbn, tbn), 1)
    if seq_n & (seq_n - 1) == 0:
        same_batch = (row ^ col) < seq_n          # power-of-two fast path, no int divide
    else:
        same_batch = (row // seq_n) == (col // seq_n)
    s = jnp.where(same_batch[None], s, -1e30)

    # Masked softmax.  Every row has at least one valid column (its own diagonal block),
    # so the -1e30 additive mask can never produce a 0/0.
    s_max = jnp.max(s, axis=-1, keepdims=True)
    e = jnp.exp(s - s_max)
    denom = jnp.sum(e, axis=-1, keepdims=True)
    r = pl.reciprocal(denom, approx=True)         # EUP slot (free-ish)
    r = r * (2.0 - denom * r)                     # one Newton step -> f32-accurate
    p = e * r

    if with_attn:
        attn_refs[0][...] = p                     # single per-tile store

    o = jnp.einsum('hij,hjd->hid', p, v,
                   preferred_element_type=jnp.float32)                   # (H, TBN, v_dim)

    # Head-unpack folded into the output projection: y = sum_h o_h @ W_o[h] + b.
    y = jnp.dot(o[0], wo_ref[0], preferred_element_type=jnp.float32)
    for h in range(1, heads):
        y = y + jnp.dot(o[h], wo_ref[h], preferred_element_type=jnp.float32)
    out_ref[...] = (y + bo_ref[...]).astype(out_ref.dtype)


# ------------------------------ host-side param packing -------------------------------
def prepare_params(w_qk, w_v, w_o, b_o, *, heads, qk_dim, v_dim):
    """One-time parameter transform into the kernel's per-head layout."""
    dim = w_qk.shape[0]
    inner_qk = heads * qk_dim
    scale = qk_dim ** -0.5
    wq = (w_qk[:, :inner_qk] * scale).reshape(dim, heads, qk_dim).transpose(1, 0, 2)
    wk = w_qk[:, inner_qk:].reshape(dim, heads, qk_dim).transpose(1, 0, 2)
    wv = w_v.reshape(dim, heads, v_dim).transpose(1, 0, 2)
    wqkv3 = jnp.concatenate([wq, wk, wv], axis=-1)          # (H, DIM, 2*qk_dim + v_dim)
    wo3 = w_o.reshape(heads, v_dim, dim)                    # (H, v_dim, DIM)
    return wqkv3, wo3, b_o.reshape(1, dim)


# ----------------------------------- host wrapper --------------------------------------
def base_attention_forward(x, wqkv3, wo3, b_o, *, heads=HEADS, qk_dim=QK_DIM,
                           v_dim=V_DIM, return_attn=True, batch_tile=None):
    """x: (B, N, DIM) (or (N, DIM)). Returns (out (B, N, DIM), attn (B, H, N, N) or None).

    Fold any time/rollout dimensions into B before calling: the kernel tiles the batch
    axis, so arbitrarily large batches go through a single pallas_call.
    """
    if x.ndim == 2:
        x = x[None]
    b, n, dim = x.shape
    bn = b * n

    # Batches per grid step: aim for ~128 rows per tile, must divide b, keep (8,*)-aligned.
    if batch_tile is None:
        batch_tile = max(1, 128 // n)
    tb = min(batch_tile, b)
    while b % tb:
        tb -= 1
    if (tb * n) % 8 != 0:
        tb = b                      # single full block: full-dim exemption covers alignment
    tbn = tb * n
    num_tiles = b // tb

    x2 = x.reshape(bn, dim)

    kernel = functools.partial(_base_attention_kernel, heads=heads, qk_dim=qk_dim,
                               v_dim=v_dim, seq_n=n, with_attn=return_attn)

    # Index maps work both with a 1-D grid (args = (i,)) and with no grid (no args).
    def row_map(*i):
        return ((i[0] if i else 0), 0)

    def w_map(*_):
        return (0, 0, 0)

    def b_map(*_):
        return (0, 0)

    def attn_map(*i):
        return (0, (i[0] if i else 0), 0)

    in_specs = [
        pl.BlockSpec((tbn, dim), row_map),          # x rows for this batch tile
        pl.BlockSpec(wqkv3.shape, w_map),           # fused per-head [Wq*scale | Wk | Wv]
        pl.BlockSpec(wo3.shape, w_map),             # per-head W_o slabs
        pl.BlockSpec(b_o.shape, b_map),             # bias
    ]
    out_shape = [jax.ShapeDtypeStruct((bn, dim), x.dtype)]
    out_specs = [pl.BlockSpec((tbn, dim), row_map)]
    if return_attn:
        out_shape.append(jax.ShapeDtypeStruct((heads, bn, tbn), jnp.float32))
        out_specs.append(pl.BlockSpec((heads, tbn, tbn), attn_map))

    # Single tile -> no grid scaffolding at all; otherwise a 'parallel' batch-tile axis
    # (sharded across the two TensorCores on v7x, harmless on v5e/v6e).
    grid = (num_tiles,) if num_tiles > 1 else ()
    call_kwargs = {}
    if grid:
        call_kwargs["compiler_params"] = pltpu.CompilerParams(
            dimension_semantics=("parallel",) * len(grid))

    results = pl.pallas_call(
        kernel,
        out_shape=tuple(out_shape),
        grid=grid,
        in_specs=in_specs,
        out_specs=tuple(out_specs),
        **call_kwargs,
    )(x2, wqkv3, wo3, b_o)

    out = results[0].reshape(b, n, dim)
    if not return_attn:
        return out, None

    # Unpack the per-tile (H, tbn, tbn) slabs to (B, H, N, N): take the per-batch
    # diagonal N x N blocks (plain-JAX plumbing outside the kernel).
    ap = results[1].reshape(heads, num_tiles, tb, n, tb, n)
    diag = jnp.diagonal(ap, axis1=2, axis2=4)               # (H, tiles, n, n, tb)
    attn = jnp.moveaxis(diag, -1, 2).reshape(heads, b, n, n).transpose(1, 0, 2, 3)
    return out, attn


# ------------------------------- plain-JAX reference ----------------------------------
def reference_forward(x, w_qk, w_v, w_o, b_o):
    qk = x @ w_qk
    q, k = jnp.split(qk, 2, axis=-1)
    v = x @ w_v

    def split_heads(t, dh):
        b_, n_, _ = t.shape
        return t.reshape(b_, n_, HEADS, dh).transpose(0, 2, 1, 3)   # b h n d

    qh, kh, vh = split_heads(q, QK_DIM), split_heads(k, QK_DIM), split_heads(v, V_DIM)
    s = jnp.einsum('bhid,bhjd->bhij', qh, kh) * SCALE
    p = jax.nn.softmax(s, axis=-1)
    o = jnp.einsum('bhij,bhjd->bhid', p, vh)
    o = o.transpose(0, 2, 1, 3).reshape(x.shape[0], x.shape[1], INNER_V)   # b n (h d)
    return o @ w_o + b_o, p


# --------------------------------------- main -----------------------------------------
if __name__ == "__main__":
    key = jax.random.PRNGKey(0)
    k_x, k_qk, k_v, k_o, k_b, k_xb = jax.random.split(key, 6)

    # Deterministic "Linear" parameters (PyTorch-style uniform(-1/sqrt(fan_in), +...)).
    def linear_w(k, fan_in, fan_out):
        bound = 1.0 / (fan_in ** 0.5)
        # stored as (in, out) so the kernel computes x @ W
        return jax.random.uniform(k, (fan_in, fan_out), jnp.float32, -bound, bound)

    w_qk = linear_w(k_qk, DIM, 2 * INNER_QK)          # to_qk (bias=False)
    w_v = linear_w(k_v, DIM, INNER_V)                 # to_v  (bias=False)
    w_o = linear_w(k_o, INNER_V, DIM)                 # to_out[0] weight
    b_o = jax.random.uniform(k_b, (1, DIM), jnp.float32,
                             -1.0 / (INNER_V ** 0.5), 1.0 / (INNER_V ** 0.5))

    # One-time parameter transform into the kernel's per-head layout.
    wqkv3, wo3, b_o2 = prepare_params(w_qk, w_v, w_o, b_o,
                                      heads=HEADS, qk_dim=QK_DIM, v_dim=V_DIM)

    # --- small shape (B=2, N=8): single-block path (no grid), attn returned -------------
    x = jax.random.normal(k_x, (B, N, DIM), jnp.float32)
    out, attn = base_attention_forward(x, wqkv3, wo3, b_o2, heads=HEADS, qk_dim=QK_DIM,
                                       v_dim=V_DIM, return_attn=True)
    jax.block_until_ready((out, attn))

    ref_out, ref_attn = reference_forward(x, w_qk, w_v, w_o, b_o)
    assert jnp.allclose(out, ref_out, atol=1e-4, rtol=1e-4), "output mismatch vs reference"
    assert jnp.allclose(attn, ref_attn, atol=1e-4, rtol=1e-4), "attn-info mismatch vs reference"

    # --- larger batch (B=64): tiled 'parallel' grid path (v7x megacore), no attn --------
    xb = jax.random.normal(k_xb, (64, N, DIM), jnp.float32)
    out_b, _ = base_attention_forward(xb, wqkv3, wo3, b_o2, heads=HEADS, qk_dim=QK_DIM,
                                      v_dim=V_DIM, return_attn=False)
    jax.block_until_ready(out_b)
    ref_out_b, _ = reference_forward(xb, w_qk, w_v, w_o, b_o)
    assert jnp.allclose(out_b, ref_out_b, atol=1e-4, rtol=1e-4), "output mismatch (batched)"

    print("KERNEL_OK")
</pallas_src>

<mosaic_0001>
module attributes {stable_mosaic.version = 11 : i64} {
  func.func @_base_attention_kernel(%arg0: memref<16x32xf32, #tpu.memory_space<vmem>>, %arg1: memref<4x32x24xf32, #tpu.memory_space<vmem>>, %arg2: memref<4x8x32xf32, #tpu.memory_space<vmem>>, %arg3: memref<1x32xf32, #tpu.memory_space<vmem>>, %arg4: memref<16x32xf32, #tpu.memory_space<vmem>>, %arg5: memref<4x16x16xf32, #tpu.memory_space<vmem>>) attributes {dimension_semantics = [], scalar_prefetch = 0 : i64, scratch_operands = 0 : i64, tpu.core_type = #tpu.core_type<tc>} {
    %c0 = arith.constant 0 : index
    %c0_0 = arith.constant 0 : index
    %0 = vector.load %arg0[%c0, %c0_0] : memref<16x32xf32, #tpu.memory_space<vmem>>, vector<16x32xf32>
    %1 = vector.shape_cast %0 : vector<16x32xf32> to vector<1x16x32xf32>
    %2 = vector.shape_cast %1 : vector<1x16x32xf32> to vector<1x16x32xf32>
    %3 = vector.broadcast %2 : vector<1x16x32xf32> to vector<4x16x32xf32>
    %c0_1 = arith.constant 0 : index
    %c0_2 = arith.constant 0 : index
    %c0_3 = arith.constant 0 : index
    %4 = vector.load %arg1[%c0_1, %c0_2, %c0_3] : memref<4x32x24xf32, #tpu.memory_space<vmem>>, vector<4x32x24xf32>
    "tpu.trace_start"() <{level = 10 : i32, message = "hnd,hdk->hnk"}> : () -> ()
    %cst = arith.constant dense<0.000000e+00> : vector<4x16x24xf32>
    %5 = tpu.matmul %3, %4, %cst {dimension_numbers = #tpu.dot_dimension_numbers<[2], [1], [1], [2], [0, 0, 0, 1, 1, 2], [0], [0]>} : vector<4x16x32xf32>, vector<4x32x24xf32>, vector<4x16x24xf32> -> vector<4x16x24xf32>
    "tpu.trace_stop"() : () -> ()
    %6 = vector.extract_strided_slice %5 {offsets = [0, 0, 0], sizes = [4, 16, 8], strides = [1, 1, 1]} : vector<4x16x24xf32> to vector<4x16x8xf32>
    %7 = vector.extract_strided_slice %5 {offsets = [0, 0, 8], sizes = [4, 16, 8], strides = [1, 1, 1]} : vector<4x16x24xf32> to vector<4x16x8xf32>
    %8 = vector.extract_strided_slice %5 {offsets = [0, 0, 16], sizes = [4, 16, 8], strides = [1, 1, 1]} : vector<4x16x24xf32> to vector<4x16x8xf32>
    "tpu.trace_start"() <{level = 10 : i32, message = "hid,hjd->hij"}> : () -> ()
    %cst_4 = arith.constant dense<0.000000e+00> : vector<4x16x16xf32>
    %9 = tpu.matmul %6, %7, %cst_4 {dimension_numbers = #tpu.dot_dimension_numbers<[2], [2], [1], [1], [0, 0, 0, 1, 1, 1], [0], [0]>} : vector<4x16x8xf32>, vector<4x16x8xf32>, vector<4x16x16xf32> -> vector<4x16x16xf32>
    "tpu.trace_stop"() : () -> ()
    %10 = tpu.iota {dimensions = array<i32: 0>} : vector<16x16xi32>
    %11 = tpu.iota {dimensions = array<i32: 1>} : vector<16x16xi32>
    %12 = arith.xori %10, %11 : vector<16x16xi32>
    %c8_i32 = arith.constant 8 : i32
    %13 = vector.broadcast %c8_i32 : i32 to vector<16x16xi32>
    %14 = arith.cmpi slt, %12, %13 : vector<16x16xi32>
    %15 = vector.shape_cast %14 : vector<16x16xi1> to vector<1x16x16xi1>
    %cst_5 = arith.constant -1.000000e+30 : f32
    %16 = vector.shape_cast %15 : vector<1x16x16xi1> to vector<1x16x16xi1>
    %17 = vector.broadcast %16 : vector<1x16x16xi1> to vector<4x16x16xi1>
    %18 = vector.broadcast %cst_5 : f32 to vector<4x16x16xf32>
    %19 = arith.select %17, %9, %18 : vector<4x16x16xi1>, vector<4x16x16xf32>
    %cst_6 = arith.constant dense<0xFF800000> : vector<4x16xf32>
    %20 = vector.multi_reduction <maximumf>, %19, %cst_6 [2] : vector<4x16x16xf32> to vector<4x16xf32>
    %21 = vector.shape_cast %20 : vector<4x16xf32> to vector<4x16x1xf32>
    %22 = vector.broadcast %21 : vector<4x16x1xf32> to vector<4x16x16xf32>
    %23 = arith.subf %19, %22 : vector<4x16x16xf32>
    %24 = math.exp %23 : vector<4x16x16xf32>
    %cst_7 = arith.constant dense<0.000000e+00> : vector<4x16xf32>
    %25 = vector.multi_reduction <add>, %24, %cst_7 [2] : vector<4x16x16xf32> to vector<4x16xf32>
    %26 = vector.shape_cast %25 : vector<4x16xf32> to vector<4x16x1xf32>
    %27 = tpu.reciprocal %26 {approx = true} : vector<4x16x1xf32> -> vector<4x16x1xf32>
    %28 = arith.mulf %26, %27 : vector<4x16x1xf32>
    %cst_8 = arith.constant 2.000000e+00 : f32
    %29 = vector.broadcast %cst_8 : f32 to vector<4x16x1xf32>
    %30 = arith.subf %29, %28 : vector<4x16x1xf32>
    %31 = arith.mulf %27, %30 : vector<4x16x1xf32>
    %32 = vector.broadcast %31 : vector<4x16x1xf32> to vector<4x16x16xf32>
    %33 = arith.mulf %24, %32 : vector<4x16x16xf32>
    %c0_9 = arith.constant 0 : index
    %c0_10 = arith.constant 0 : index
    %c0_11 = arith.constant 0 : index
    %34 = vector.load %arg5[%c0_9, %c0_10, %c0_11] : memref<4x16x16xf32, #tpu.memory_space<vmem>>, vector<4x16x16xf32>
    tpu.vector_store %arg5[%c0_9, %c0_10, %c0_11], %33 {strides = array<i32>} : memref<4x16x16xf32, #tpu.memory_space<vmem>>, vector<4x16x16xf32>,
    "tpu.trace_start"() <{level = 10 : i32, message = "hij,hjd->hid"}> : () -> ()
    %cst_12 = arith.constant dense<0.000000e+00> : vector<4x16x8xf32>
    %35 = tpu.matmul %33, %8, %cst_12 {dimension_numbers = #tpu.dot_dimension_numbers<[2], [1], [1], [2], [0, 0, 0, 1, 1, 2], [0], [0]>} : vector<4x16x16xf32>, vector<4x16x8xf32>, vector<4x16x8xf32> -> vector<4x16x8xf32>
    "tpu.trace_stop"() : () -> ()
    %36 = vector.extract_strided_slice %35 {offsets = [0, 0, 0], sizes = [1, 16, 8], strides = [1, 1, 1]} : vector<4x16x8xf32> to vector<1x16x8xf32>
    %37 = vector.shape_cast %36 : vector<1x16x8xf32> to vector<16x8xf32>
    %c0_13 = arith.constant 0 : index
    %c0_14 = arith.constant 0 : index
    %c0_15 = arith.constant 0 : index
    %38 = vector.load %arg2[%c0_13, %c0_14, %c0_15] : memref<4x8x32xf32, #tpu.memory_space<vmem>>, vector<1x8x32xf32>
    %39 = vector.shape_cast %38 : vector<1x8x32xf32> to vector<8x32xf32>
    %cst_16 = arith.constant dense<0.000000e+00> : vector<16x32xf32>
    %40 = tpu.matmul %37, %39, %cst_16 {dimension_numbers = #tpu.dot_dimension_numbers<[1], [0], [0], [1], [0, 0, 1, 1], [], []>} : vector<16x8xf32>, vector<8x32xf32>, vector<16x32xf32> -> vector<16x32xf32>
    %41 = vector.extract_strided_slice %35 {offsets = [1, 0, 0], sizes = [1, 16, 8], strides = [1, 1, 1]} : vector<4x16x8xf32> to vector<1x16x8xf32>
    %42 = vector.shape_cast %41 : vector<1x16x8xf32> to vector<16x8xf32>
    %c1 = arith.constant 1 : index
    %c0_17 = arith.constant 0 : index
    %c0_18 = arith.constant 0 : index
    %43 = vector.load %arg2[%c1, %c0_17, %c0_18] : memref<4x8x32xf32, #tpu.memory_space<vmem>>, vector<1x8x32xf32>
    %44 = vector.shape_cast %43 : vector<1x8x32xf32> to vector<8x32xf32>
    %cst_19 = arith.constant dense<0.000000e+00> : vector<16x32xf32>
    %45 = tpu.matmul %42, %44, %cst_19 {dimension_numbers = #tpu.dot_dimension_numbers<[1], [0], [0], [1], [0, 0, 1, 1], [], []>} : vector<16x8xf32>, vector<8x32xf32>, vector<16x32xf32> -> vector<16x32xf32>
    %46 = arith.addf %40, %45 : vector<16x32xf32>
    %47 = vector.extract_strided_slice %35 {offsets = [2, 0, 0], sizes = [1, 16, 8], strides = [1, 1, 1]} : vector<4x16x8xf32> to vector<1x16x8xf32>
    %48 = vector.shape_cast %47 : vector<1x16x8xf32> to vector<16x8xf32>
    %c2 = arith.constant 2 : index
    %c0_20 = arith.constant 0 : index
    %c0_21 = arith.constant 0 : index
    %49 = vector.load %arg2[%c2, %c0_20, %c0_21] : memref<4x8x32xf32, #tpu.memory_space<vmem>>, vector<1x8x32xf32>
    %50 = vector.shape_cast %49 : vector<1x8x32xf32> to vector<8x32xf32>
    %cst_22 = arith.constant dense<0.000000e+00> : vector<16x32xf32>
    %51 = tpu.matmul %48, %50, %cst_22 {dimension_numbers = #tpu.dot_dimension_numbers<[1], [0], [0], [1], [0, 0, 1, 1], [], []>} : vector<16x8xf32>, vector<8x32xf32>, vector<16x32xf32> -> vector<16x32xf32>
    %52 = arith.addf %46, %51 : vector<16x32xf32>
    %53 = vector.extract_strided_slice %35 {offsets = [3, 0, 0], sizes = [1, 16, 8], strides = [1, 1, 1]} : vector<4x16x8xf32> to vector<1x16x8xf32>
    %54 = vector.shape_cast %53 : vector<1x16x8xf32> to vector<16x8xf32>
    %c3 = arith.constant 3 : index
    %c0_23 = arith.constant 0 : index
    %c0_24 = arith.constant 0 : index
    %55 = vector.load %arg2[%c3, %c0_23, %c0_24] : memref<4x8x32xf32, #tpu.memory_space<vmem>>, vector<1x8x32xf32>
    %56 = vector.shape_cast %55 : vector<1x8x32xf32> to vector<8x32xf32>
    %cst_25 = arith.constant dense<0.000000e+00> : vector<16x32xf32>
    %57 = tpu.matmul %54, %56, %cst_25 {dimension_numbers = #tpu.dot_dimension_numbers<[1], [0], [0], [1], [0, 0, 1, 1], [], []>} : vector<16x8xf32>, vector<8x32xf32>, vector<16x32xf32> -> vector<16x32xf32>
    %58 = arith.addf %52, %57 : vector<16x32xf32>
    %c0_26 = arith.constant 0 : index
    %c0_27 = arith.constant 0 : index
    %59 = vector.load %arg3[%c0_26, %c0_27] : memref<1x32xf32, #tpu.memory_space<vmem>>, vector<1x32xf32>
    %60 = vector.broadcast %59 : vector<1x32xf32> to vector<16x32xf32>
    %61 = arith.addf %58, %60 : vector<16x32xf32>
    %c0_28 = arith.constant 0 : index
    %c0_29 = arith.constant 0 : index
    %62 = vector.load %arg4[%c0_28, %c0_29] : memref<16x32xf32, #tpu.memory_space<vmem>>, vector<16x32xf32>
    tpu.vector_store %arg4[%c0_28, %c0_29], %61 {strides = array<i32>} : memref<16x32xf32, #tpu.memory_space<vmem>>, vector<16x32xf32>,
    return
  }
}

</mosaic_0001>

<bundles_post_ra>
// kernel: tpu_custom_call.1
= control target key start
LH: loop header
LB: loop body
LE: loop exit
PB: predicated region body
PF: predicated region fallthrough
CT: control target
= control target key end

     0   :  { %11 = vsyncpa [#allocation3], 0  ;;  %vm39_vm0 = vcmask 261120   ;;  %s2292_s0 = inlined_call_operand.vmem [shape: f32[16,32], index: 0, kind: input, shape index: {}]   ;;  %s2293_s1 = inlined_call_operand.vmem [shape: f32[4,32,24], index: 1, kind: input, shape index: {}]   ;;  %s2294_s2 = inlined_call_operand.vmem [shape: f32[4,8,32], index: 2, kind: input, shape index: {}]   ;;  %s2295_s3 = inlined_call_operand.vmem [shape: f32[1,32], index: 3, kind: input, shape index: {}]   ;;  %s2296_s4 = inlined_call_operand.hbm [shape: f32[16,32], index: 4, kind: output, shape index: {0}]   ;;  %s2297_s5 = inlined_call_operand.hbm [shape: f32[4,16,16], index: 5, kind: output, shape index: {1}]  }
   0x1   :  { %v23_v0 = vld [vmem:[%s2293_s1] sm:$0xff]  ;;  %v24_v1 = vld [vmem:[%s2293_s1 + $0x8] sm:$0xff]  ;;  %v25_v2 = vld [vmem:[%s2293_s1 + $0x10] sm:$0xff] }
   0x2   :  { %v1803_v3 = vpack.c.bf16 %v24_v1, %v23_v0  ;;  %v26_v4 = vld [vmem:[%s2293_s1 + $0x18] sm:$0xff]  ;;  %v21_v5 = vld [vmem:[%s2292_s0] sm:$0xff]  ;;  %v28_v8 = vld [vmem:[%s2293_s1 + $0x28] sm:$0xff] }
   0x3   :  { %v1807_v6 = vpack.c.bf16 %v26_v4, %v25_v2  ;;  %1691 = vmatprep.mubr.msk.f32.mxu1 %vm39_vm0, %v21_v5  ;;  %v27_v7 = vld [vmem:[%s2293_s1 + $0x20] sm:$0xff]  ;;  %1713 = vmatprep.mubr.msk.f32.mxu0 %vm39_vm0, %v21_v5  ;;  %v32_v10 = vld [vmem:[%s2293_s1 + $0x48] sm:$0xff]  ;;  %v33_v12 = vld [vmem:[%s2293_s1 + $0x50] sm:$0xff] }
   0x4   :  { %1804 = vmatprep.subr.bf16.mxu1 %v1803_v3  ;;  %v31_v9 = vld [vmem:[%s2293_s1 + $0x40] sm:$0xff]  ;;  %v34_v13 = vld [vmem:[%s2293_s1 + $0x58] sm:$0xff]  ;;  %v1811_v14 = vpack.c.bf16 %v28_v8, %v27_v7  ;;  %v29_v16 = vld [vmem:[%s2293_s1 + $0x30] sm:$0xff] }
   0x5   :  { %1806 = vmatpush3.bf16.msra.mxu1 %v1803_v3  ;;  %v1819_v11 = vpack.c.bf16 %v32_v10, %v31_v9  ;;  %v1823_v15 = vpack.c.bf16 %v34_v13, %v33_v12  ;;  %v30_v17 = vld [vmem:[%s2293_s1 + $0x38] sm:$0xff] }
   0x6   :  { %1808 = vmatprep.subr.bf16.mxu1 %v1807_v6 }
   0x7   :  { %1820 = vmatprep.subr.bf16.mxu0 %v1819_v11 }
   0x8   :  { %12 = vsyncpa [#allocation5], 0  ;;  %1822 = vmatpush3.bf16.msra.mxu0 %v1819_v11  ;;  %v22_v18 = vld [vmem:[%s2292_s0 + $0x8] sm:$0xff]  ;;  %v1815_v19 = vpack.c.bf16 %v30_v17, %v29_v16  ;;  %v35_v20 = vld [vmem:[%s2293_s1 + $0x60] sm:$0xff]  ;;  %vm352_vm1 = vcmask 64512   ;;  %v703_v55 = vlaneseq  ;;  %vm724_vm5 = vcmask 130048  }
   0x9   :  { %1810 = vmatpush3.bf16.msra.mxu1 %v1807_v6  ;;  %1824 = vmatprep.subr.bf16.mxu0 %v1823_v15  ;;  %v36_v21 = vld [vmem:[%s2293_s1 + $0x68] sm:$0xff]  ;;  %v37_v23 = vld [vmem:[%s2293_s1 + $0x70] sm:$0xff]  ;;  %v38_v24 = vld [vmem:[%s2293_s1 + $0x78] sm:$0xff]  ;;  %s2007_s1 = smov 120   ;;  %s2008_s28 = smov 112  }
   0xa   :  { %1812 = vmatprep.subr.bf16.mxu1 %v1811_v14  ;;  %v1827_v22 = vpack.c.bf16 %v36_v21, %v35_v20  ;;  %v1831_v25 = vpack.c.bf16 %v38_v24, %v37_v23  ;;  %vm2121_vm2 = vmpackc.low %vm352_vm1, %vm352_vm1  ;;  %v704_v56 = vshrl.u32 %v703_v55, 7  ;;  %v707_v58 = vand.u32 127, %v703_v55  ;;  %s2009_s12 = smov [#allocation4]  }
   0xb   :  { %s1556_s13 = sshll.u32 %s2009_s12, 4  ;;  %s1557_s13 = int_to_ptr.vmem [resolvable:$true] %s1556_s13 }
   0xc   :  { %1692 = vmatmul.mubr.msk.f32.vlgmr.msra.gmra.mrb[0].mxu1 %vm39_vm0, %v22_v18  ;;  %1826 = vmatpush3.bf16.msra.mxu0 %v1823_v15  ;;  %v705_v57 = vadd.s32 8, %v704_v56  ;;  %v708_v60 = vxor.u32 %v707_v58, %v704_v56  ;;  %s1959_s14 = scalar_lea.vmem %s1557_s13, 1024  ;;  %p1964_p1 = scmp.lt.s32.totalorder %s1557_s13, %s1557_s13 }
   0xd   :  { %1814 = vmatpush3.bf16.msra.mxu1 %v1811_v14  ;;  %1702 = vmatprep.mubr.msk.f32.mxu1 %vm39_vm0, %v21_v5  ;;  %p1960_p0 = scmp.ne.s32.totalorder %s1557_s13, %s1959_s14  ;;  %p1965_p2 = scmp.lt.s32.totalorder %s1959_s14, %s1959_s14 }
   0xe   :  { %1816 = vmatprep.subr.bf16.mxu1 %v1815_v19  ;;  %v709_v59 = vxor.u32 %v707_v58, %v705_v57  ;;  %vm2151_vm4 = vcmp.lt.s32.totalorder %v708_v60, 8 }
   0xf   :  { %1714 = vmatmul.mubr.msk.f32.vlgmr.msra.gmra.mrb[0].mxu0 %vm39_vm0, %v22_v18  ;;  %p1966_p3 = por %p1965_p2, %p1964_p1 }
  0x10   :  { %vm2147_vm3 = vcmp.lt.s32.totalorder %v709_v59, 8 }
  0x11   :  { %1818 = vmatpush3.bf16.msra.mxu1 %v1815_v19  ;;  %p1967_p4 = pnand %p1966_p3, %p1960_p0 }
  0x12   :  { %1828 = vmatprep.subr.bf16.mxu1 %v1827_v22 }
  0x14   :  { %1703 = vmatmul.mubr.msk.f32.vlgmr.msra.gmra.mrb[2].mxu1 %vm39_vm0, %v22_v18 }
  0x15   :  { %1830 = vmatpush3.bf16.msra.mxu1 %v1827_v22  ;;  %1724 = vmatprep.mubr.msk.f32.mxu1 %vm39_vm0, %v21_v5 }
  0x16   :  { %1832 = vmatprep.subr.bf16.mxu1 %v1831_v25 }
  0x19   :  { %1834 = vmatpush3.bf16.msra.mxu1 %v1831_v25 }
  0x1c   :  { %1725 = vmatmul.mubr.msk.f32.vlgmr.msra.gmra.mrb[4].mxu1 %vm39_vm0, %v22_v18 }
  0xdf   :  { %v1693_v26 = vpop.f32.mrb[0].mxu1 }
  0xe0   :  { %v112_v27 = vpop.f32.mrb[1].mxu1 }
  0xe1   :  { %v2105_v28 = vpack.i.bf16 %v1693_v26, %v112_v27  ;;  %1731 = vmatprep.mubr.msk.f32.mxu0 %vm352_vm1, %v112_v27 }
  0xe2   :  { %v1715_v29 = vpop.f32.mrb[0].mxu0 }
  0xe3   :  { %v262_v30 = vpop.f32.mrb[1].mxu0 }
  0xe4   :  { %v2108_v31 = vpack.i.bf16 %v1715_v29, %v262_v30 }
  0xe6   :  { %1898 = vrot.lane.b32.xlu1 %v2108_v31, %s2007_s1 }
  0xe7   :  { %v1704_v32 = vpop.f32.mrb[2].mxu1 }
  0xe8   :  { %v187_v33 = vpop.f32.mrb[3].mxu1 }
  0xe9   :  { %v2111_v34 = vpack.i.bf16 %v1704_v32, %v187_v33  ;;  %1738 = vmatprep.mubr.msk.f32.mxu1 %vm352_vm1, %v187_v33 }
  0xeb   :  { %1888 = vrot.lane.b32.xlu0 %v2111_v34, %s2007_s1 }
  0xef   :  { %1893 = vrot.lane.b32.xlu0 %v2105_v28, %s2007_s1  ;;  %v1726_v35 = vpop.f32.mrb[4].mxu1 }
  0xf0   :  { %v337_v36 = vpop.f32.mrb[5].mxu1 }
  0xf1   :  { %v2116_v37 = vpack.i.bf16 %v1726_v35, %v337_v36 }
  0xf3   :  { %1903 = vrot.lane.b32.xlu1 %v2116_v37, %s2007_s1 }
 0x158   :  { %v1899_v41 = vpop.permute.xlu1 %1898 }
 0x159   :  { %v1901_v44 = vunpack.i.h.bf16 %v1899_v41  ;;  %v1900_v45 = vunpack.i.l.bf16 %v1899_v41 }
 0x15b   :  { %v1847_v49 = vpack.c.bf16 %v1901_v44, %v1900_v45 }
 0x15d   :  { %v1889_v38 = vpop.permute.xlu0 %1888 }
 0x15e   :  { %v1891_v39 = vunpack.i.h.bf16 %v1889_v38  ;;  %v1890_v40 = vunpack.i.l.bf16 %v1889_v38 }
 0x160   :  { %v1841_v43 = vpack.c.bf16 %v1891_v39, %v1890_v40 }
 0x161   :  { %v1894_v46 = vpop.permute.xlu0 %1893 }
 0x162   :  { %v1896_v47 = vunpack.i.h.bf16 %v1894_v46  ;;  %v1895_v48 = vunpack.i.l.bf16 %v1894_v46  ;;  %1843 = vmatprep.subr.msk.bf16.mxu1 %vm2121_vm2, %v1841_v43 }
 0x163   :  { %1846 = vmatpush3.bf16.xpose.msk.msra.mxu1 %vm2121_vm2, %v1841_v43 }
 0x164   :  { %v1835_v50 = vpack.c.bf16 %v1896_v47, %v1895_v48 }
 0x165   :  { %v1904_v51 = vpop.permute.xlu1 %1903 }
 0x166   :  { %v1906_v52 = vunpack.i.h.bf16 %v1904_v51  ;;  %v1905_v53 = vunpack.i.l.bf16 %v1904_v51  ;;  %1837 = vmatprep.subr.msk.bf16.mxu0 %vm2121_vm2, %v1835_v50 }
 0x167   :  { %1840 = vmatpush3.bf16.xpose.msk.msra.mxu0 %vm2121_vm2, %v1835_v50 }
 0x168   :  { %v1853_v54 = vpack.c.bf16 %v1906_v52, %v1905_v53  ;;  %1849 = vmatprep.subr.msk.bf16.mxu0 %vm2121_vm2, %v1847_v49 }
 0x16a   :  { %1739 = vmatmul.mubr.msk.f32.vlgmr.msra.gmra.mrb[6].mxu1 %vm352_vm1, %v1704_v32  ;;  %1855 = vmatprep.subr.msk.bf16.mxu1 %vm2121_vm2, %v1853_v54 }
 0x16b   :  { %1858 = vmatpush3.bf16.xpose.msk.msra.mxu1 %vm2121_vm2, %v1853_v54  ;;  %1752 = vmatprep.mubr.msk.f32.mxu1 %vm352_vm1, %v337_v36 }
 0x16e   :  { %1732 = vmatmul.mubr.msk.f32.vlgmr.msra.gmra.mrb[2].mxu0 %vm352_vm1, %v1693_v26 }
 0x16f   :  { %1852 = vmatpush3.bf16.xpose.msk.msra.mxu0 %vm2121_vm2, %v1847_v49  ;;  %1745 = vmatprep.mubr.msk.f32.mxu0 %vm352_vm1, %v262_v30 }
 0x172   :  { %1753 = vmatmul.mubr.msk.f32.vlgmr.msra.gmra.mrb[8].mxu1 %vm352_vm1, %v1726_v35 }
 0x176   :  { %1746 = vmatmul.mubr.msk.f32.vlgmr.msra.gmra.mrb[4].mxu0 %vm352_vm1, %v1715_v29 }
 0x23d   :  { %v1740_v63 = vpop.f32.mrb[6].mxu1 }
 0x23e   :  { %v719_v0 = vsel %vm2147_vm3, %v1740_v63, -1e+30  ;;  %v516_v1 = vpop.f32.mrb[7].mxu1 }
 0x23f   :  { %v718_v2 = vsel %vm2151_vm4, %v516_v1, -1e+30  ;;  %v734_v3 = vsel %vm724_vm5, %v719_v0, -inf }
 0x240   :  { %735 = vmax.xlane.f32.xlu1 %v734_v3  ;;  %v731_v4 = vsel %vm724_vm5, %v718_v2, -inf }
 0x241   :  { %v1733_v5 = vpop.f32.mrb[2].mxu0  ;;  %732 = vmax.xlane.f32.xlu0 %v731_v4 }
 0x242   :  { %v427_v6 = vpop.f32.mrb[3].mxu0  ;;  %v717_v9 = vsel %vm2147_vm3, %v1733_v5, -1e+30 }
 0x243   :  { %v716_v7 = vsel %vm2151_vm4, %v427_v6, -1e+30  ;;  %v728_v12 = vsel %vm724_vm5, %v717_v9, -inf }
 0x244   :  { %v725_v8 = vsel %vm724_vm5, %v716_v7, -inf }
 0x245   :  { %726 = vmax.xlane.f32.xlu0 %v725_v8  ;;  %v1754_v10 = vpop.f32.mrb[8].mxu1 }
 0x246   :  { %v694_v11 = vpop.f32.mrb[9].mxu1  ;;  %v723_v19 = vsel %vm2147_vm3, %v1754_v10, -1e+30 }
 0x247   :  { %v2177_v20 = vsel %vm2151_vm4, %v694_v11, -1e+30  ;;  %v746_v21 = vsel %vm724_vm5, %v723_v19, -inf }
 0x248   :  { %v743_v22 = vsel %vm724_vm5, %v2177_v20, -inf }
 0x249   :  { %v1747_v13 = vpop.f32.mrb[4].mxu0  ;;  %729 = vmax.xlane.f32.xlu0 %v728_v12 }
 0x24a   :  { %v721_v14 = vsel %vm2147_vm3, %v1747_v13, -1e+30  ;;  %v605_v15 = vpop.f32.mrb[5].mxu0 }
 0x24b   :  { %v720_v16 = vsel %vm2151_vm4, %v605_v15, -1e+30  ;;  %v740_v17 = vsel %vm724_vm5, %v721_v14, -inf }
 0x24c   :  { %v737_v18 = vsel %vm724_vm5, %v720_v16, -inf }
 0x24d   :  { %738 = vmax.xlane.f32.xlu1 %v737_v18  ;;  %741 = vmax.xlane.f32.xlu0 %v740_v17 }
 0x251   :  { %747 = vmax.xlane.f32.xlu0 %v746_v21  ;;  %744 = vmax.xlane.f32.xlu1 %v743_v22 }
 0x262   :  { %1908 = vrot.lane.b32.xlu1 %v2111_v34, %s2008_s28 }
 0x2cd   :  { %v736_v25 = vpop.xlane.xlu1 %735 }
 0x2ce   :  { %v733_v23 = vpop.xlane.xlu0 %732  ;;  %v752_v29 = vsub.f32 %v719_v0, %v736_v25 }
 0x2cf   :  { %v751_v24 = vsub.f32 %v718_v2, %v733_v23 }
 0x2d0   :  { %v763_v36 = vmul.f32 1.442695, %v752_v29 }
 0x2d1   :  { %v761_v30 = vmul.f32 1.442695, %v751_v24 }
 0x2d2   :  { %v727_v26 = vpop.xlane.xlu0 %726 }
 0x2d3   :  { %v749_v27 = vsub.f32 %v716_v7, %v727_v26 }
 0x2d5   :  { %v757_v32 = vmul.f32 1.442695, %v749_v27 }
 0x2d6   :  { %v730_v33 = vpop.xlane.xlu0 %729 }
 0x2d7   :  { %1927 = vpow2.f32 %v757_v32  ;;  %v750_v35 = vsub.f32 %v717_v9, %v730_v33 }
 0x2d8   :  { %1929 = vpow2.f32 %v761_v30 }
 0x2d9   :  { %v759_v38 = vmul.f32 1.442695, %v750_v35 }
 0x2da   :  { %v739_v39 = vpop.xlane.xlu1 %738  ;;  %v742_v40 = vpop.xlane.xlu0 %741 }
 0x2db   :  { %1931 = vpow2.f32 %v759_v38  ;;  %v753_v41 = vsub.f32 %v720_v16, %v739_v39  ;;  %v754_v42 = vsub.f32 %v721_v14, %v742_v40 }
 0x2dc   :  { %1933 = vpow2.f32 %v763_v36 }
 0x2dd   :  { %v765_v34 = vmul.f32 1.442695, %v753_v41  ;;  %v767_v43 = vmul.f32 1.442695, %v754_v42 }
 0x2de   :  { %v748_v44 = vpop.xlane.xlu0 %747  ;;  %v745_v45 = vpop.xlane.xlu1 %744 }
 0x2df   :  { %1935 = vpow2.f32 %v765_v34  ;;  %v756_v46 = vsub.f32 %v723_v19, %v748_v44  ;;  %v755_v2 = vsub.f32 %v2177_v20, %v745_v45 }
 0x2e0   :  { %1937 = vpow2.f32 %v767_v43 }
 0x2e1   :  { %v1928_v47 = vpop.eup %1927  ;;  %v771_v48 = vmul.f32 1.442695, %v756_v46  ;;  %v769_v3 = vmul.f32 1.442695, %v755_v2 }
 0x2e2   :  { %v1909_v49 = vpop.permute.xlu1 %1908  ;;  %v773_v50 = vsel %vm724_vm5, %v1928_v47, 0.0  ;;  %v2185_v51 = vpop.eup %1929 }
 0x2e3   :  { %v1911_v52 = vunpack.i.h.bf16 %v1909_v49  ;;  %v1910_v53 = vunpack.i.l.bf16 %v1909_v49  ;;  %774 = vadd.xlane.f32.xlu1 %v773_v50  ;;  %1939 = vpow2.f32 %v771_v48  ;;  %v779_v57 = vsel %vm724_vm5, %v2185_v51, 0.0 }
 0x2e4   :  { %1941 = vpow2.f32 %v769_v3  ;;  %v1193_v3 = vld [vmem:[%s2294_s2] sm:$0xff] }
 0x2e5   :  { %v2187_v54 = vpop.eup %1931  ;;  %v1863_v55 = vpack.c.bf16 %v1911_v52, %v1910_v53 }
 0x2e6   :  { %v776_v56 = vsel %vm724_vm5, %v2187_v54, 0.0  ;;  %v2193_v58 = vpop.eup %1933 }
 0x2e7   :  { %777 = vadd.xlane.f32.xlu0 %v776_v56  ;;  %780 = vadd.xlane.f32.xlu1 %v779_v57  ;;  %v782_v60 = vsel %vm724_vm5, %v2193_v58, 0.0 }
 0x2e8   :  { %1864 = vmatprep.subr.bf16.mxu1 %v1863_v55 }
 0x2e9   :  { %v2195_v59 = vpop.eup %1935  ;;  %1866 = vmatpush3.bf16.msra.mxu1 %v1863_v55 }
 0x2ea   :  { %v785_v61 = vsel %vm724_vm5, %v2195_v59, 0.0  ;;  %v2201_v62 = vpop.eup %1937 }
 0x2eb   :  { %783 = vadd.xlane.f32.xlu0 %v782_v60  ;;  %786 = vadd.xlane.f32.xlu1 %v785_v61  ;;  %v788_v63 = vsel %vm724_vm5, %v2201_v62, 0.0 }
 0x2ed   :  { %v2205_v0 = vpop.eup %1939 }
 0x2ee   :  { %v794_v1 = vsel %vm724_vm5, %v2205_v0, 0.0  ;;  %v2214_v4 = vpop.eup %1941 }
 0x2ef   :  { %789 = vadd.xlane.f32.xlu0 %v788_v63  ;;  %v791_v5 = vsel %vm724_vm5, %v2214_v4, 0.0 }
 0x2f3   :  { %795 = vadd.xlane.f32.xlu0 %v794_v1 }
 0x2fc   :  { %1918 = vrot.lane.b32.xlu1 %v2108_v31, %s2008_s28 }
 0x309   :  { %1913 = vrot.lane.b32.xlu0 %v2105_v28, %s2008_s28 }
 0x320   :  { %792 = vadd.xlane.f32.xlu1 %v791_v5 }
 0x331   :  { %1923 = vrot.lane.b32.xlu1 %v2116_v37, %s2008_s28 }
 0x370   :  { %v775_v6 = vpop.xlane.xlu1 %774 }
 0x371   :  { %1943 = vrcp.f32 %v775_v6 }
 0x374   :  { %v778_v7 = vpop.xlane.xlu0 %777  ;;  %v781_v31 = vpop.xlane.xlu1 %780 }
 0x375   :  { %1945 = vrcp.f32 %v778_v7 }
 0x376   :  { %1947 = vrcp.f32 %v781_v31 }
 0x378   :  { %v784_v28 = vpop.xlane.xlu0 %783  ;;  %v787_v8 = vpop.xlane.xlu1 %786 }
 0x379   :  { %1949 = vrcp.f32 %v784_v28 }
 0x37a   :  { %1951 = vrcp.f32 %v787_v8 }
 0x37b   :  { %v1944_v9 = vpop.eup %1943 }
 0x37c   :  { %v805_v10 = vmul.f32 %v1944_v9, %v775_v6  ;;  %v790_v11 = vpop.xlane.xlu0 %789  ;;  %v1919_v18 = vpop.permute.xlu1 %1918 }
 0x37d   :  { %1953 = vrcp.f32 %v790_v11  ;;  %v1921_v26 = vunpack.i.h.bf16 %v1919_v18  ;;  %v1920_v27 = vunpack.i.l.bf16 %v1919_v18 }
 0x37e   :  { %v813_v12 = vsub.f32 2.0, %v805_v10 }
 0x37f   :  { %v1946_v13 = vpop.eup %1945  ;;  %v1867_v45 = vpack.c.bf16 %v1921_v26, %v1920_v27 }
 0x380   :  { %v1948_v14 = vpop.eup %1947  ;;  %v821_v15 = vmul.f32 %v1944_v9, %v813_v12  ;;  %v806_v16 = vmul.f32 %v1946_v13, %v778_v7  ;;  %v796_v37 = vpop.xlane.xlu0 %795  ;;  %v1611_v9 = vld [vmem:[%s2294_s2 + $0x18] sm:$0xff] }
 0x381   :  { %v807_v17 = vmul.f32 %v1948_v14, %v781_v31  ;;  %1955 = vrcp.f32 %v796_v37  ;;  %v1608_v31 = vld [vmem:[%s2294_s2 + $0x10] sm:$0xff] }
 0x382   :  { %v829_v19 = vmul.f32 %v1928_v47, %v821_v15  ;;  %v814_v20 = vsub.f32 2.0, %v806_v16 }
 0x383   :  { %v1950_v21 = vpop.eup %1949  ;;  %v815_v22 = vsub.f32 2.0, %v807_v17 }
 0x384   :  { %v1952_v23 = vpop.eup %1951  ;;  %837 = vst.msk [vmem:[#allocation4] sm:$0xff] %vm724_vm5, %v829_v19  ;;  %v822_v24 = vmul.f32 %v1946_v13, %v814_v20  ;;  %v808_v25 = vmul.f32 %v1950_v21, %v784_v28  ;;  %v1914_v29 = vpop.permute.xlu0 %1913  ;;  %1759 = vmatprep.mubr.msk.f32.mxu0 %vm724_vm5, %v829_v19 }
 0x385   :  { %v823_v30 = vmul.f32 %v1948_v14, %v815_v22  ;;  %v809_v32 = vmul.f32 %v1952_v23, %v787_v8  ;;  %v1916_v33 = vunpack.i.h.bf16 %v1914_v29  ;;  %v1915_v35 = vunpack.i.l.bf16 %v1914_v29 }
 0x386   :  { %v830_v36 = vmul.f32 %v2187_v54, %v822_v24  ;;  %v816_v38 = vsub.f32 2.0, %v808_v25 }
 0x387   :  { %v1954_v39 = vpop.eup %1953  ;;  %v831_v40 = vmul.f32 %v2185_v51, %v823_v30  ;;  %v817_v41 = vsub.f32 2.0, %v809_v32  ;;  %v1859_v42 = vpack.c.bf16 %v1916_v33, %v1915_v35 }
 0x388   :  { %838 = vst.msk [vmem:[#allocation4 + $0x8] sm:$0xff] %vm724_vm5, %v830_v36  ;;  %v824_v34 = vmul.f32 %v1950_v21, %v816_v38  ;;  %v810_v43 = vmul.f32 %v1954_v39, %v790_v11 }
 0x389   :  { %839 = vst.msk [vmem:[#allocation4 + $0x10] sm:$0xff] %vm724_vm5, %v831_v40  ;;  %v825_v44 = vmul.f32 %v1952_v23, %v817_v41  ;;  %1766 = vmatprep.mubr.msk.f32.mxu1 %vm724_vm5, %v831_v40  ;;  %1860 = vmatprep.subr.bf16.mxu0 %v1859_v42 }
 0x38a   :  { %v832_v46 = vmul.f32 %v2193_v58, %v824_v34  ;;  %v818_v47 = vsub.f32 2.0, %v810_v43  ;;  %1862 = vmatpush3.bf16.msra.mxu0 %v1859_v42 }
 0x38b   :  { %v1956_v48 = vpop.eup %1955  ;;  %v833_v49 = vmul.f32 %v2195_v59, %v825_v44  ;;  %1868 = vmatprep.subr.bf16.mxu0 %v1867_v45 }
 0x38c   :  { %840 = vst.msk [vmem:[#allocation4 + $0x18] sm:$0xff] %vm724_vm5, %v832_v46  ;;  %v826_v50 = vmul.f32 %v1954_v39, %v818_v47  ;;  %v812_v51 = vmul.f32 %v1956_v48, %v796_v37  ;;  %1767 = vmatmul.mubr.msk.f32.vlgmr.msra.gmra.mrb[10].mxu1 %vm724_vm5, %v832_v46 }
 0x38d   :  { %841 = vst.msk [vmem:[#allocation4 + $0x20] sm:$0xff] %vm724_vm5, %v833_v49  ;;  %1760 = vmatmul.mubr.msk.f32.vlgmr.msra.gmra.mrb[6].mxu0 %vm724_vm5, %v830_v36 }
 0x38e   :  { %v834_v52 = vmul.f32 %v2201_v62, %v826_v50  ;;  %v820_v53 = vsub.f32 2.0, %v812_v51  ;;  %1870 = vmatpush3.bf16.msra.mxu0 %v1867_v45  ;;  %1773 = vmatprep.mubr.msk.f32.mxu0 %vm724_vm5, %v833_v49 }
 0x390   :  { %842 = vst.msk [vmem:[#allocation4 + $0x28] sm:$0xff] %vm724_vm5, %v834_v52  ;;  %v828_v54 = vmul.f32 %v1956_v48, %v820_v53 }
 0x391   :  { %1774 = vmatmul.mubr.msk.f32.vlgmr.msra.gmra.mrb[8].mxu0 %vm724_vm5, %v834_v52 }
 0x392   :  { %v836_v55 = vmul.f32 %v2205_v0, %v828_v54  ;;  %v1603_v0 = vld [vmem:[%s2294_s2 + $0x8] sm:$0xff] }
 0x393   :  { %1783 = vmatprep.subr.mxu0 %v1603_v0 }
 0x394   :  { %844 = vst.msk [vmem:[#allocation4 + $0x38] sm:$0xff] %vm724_vm5, %v836_v55  ;;  %1784 = vmatpush3.msra.mxu0 %v1603_v0 }
 0x395   :  { %1788 = vmatprep.subr.mxu0 %v1193_v3 }
 0x3ad   :  { %v793_v56 = vpop.xlane.xlu1 %792 }
 0x3ae   :  { %1957 = vrcp.f32 %v793_v56 }
 0x3b1   :  { %v1924_v57 = vpop.permute.xlu1 %1923 }
 0x3b2   :  { %v1926_v58 = vunpack.i.h.bf16 %v1924_v57  ;;  %v1925_v59 = vunpack.i.l.bf16 %v1924_v57 }
 0x3b4   :  { %v1871_v60 = vpack.c.bf16 %v1926_v58, %v1925_v59 }
 0x3b6   :  { %1872 = vmatprep.subr.bf16.mxu1 %v1871_v60 }
 0x3b7   :  { %1874 = vmatpush3.bf16.msra.mxu1 %v1871_v60 }
 0x3b8   :  { %v1958_v61 = vpop.eup %1957 }
 0x3b9   :  { %v811_v62 = vmul.f32 %v1958_v61, %v793_v56 }
 0x3bb   :  { %v819_v63 = vsub.f32 2.0, %v811_v62 }
 0x3bd   :  { %v827_v1 = vmul.f32 %v1958_v61, %v819_v63 }
 0x3bf   :  { %v835_v2 = vmul.f32 %v2214_v4, %v827_v1 }
 0x3c1   :  { %843 = vst.msk [vmem:[#allocation4 + $0x30] sm:$0xff] %vm724_vm5, %v835_v2  ;;  %1780 = vmatprep.mubr.msk.f32.mxu1 %vm724_vm5, %v835_v2 }
 0x3c2   :  { %1781 = vmatmul.mubr.msk.f32.vlgmr.msra.gmra.mrb[12].mxu1 %vm724_vm5, %v836_v55 }
 0x45f   :  { %v1768_v5 = vpop.f32.mrb[10].mxu1 }
 0x460   :  { %v1761_v6 = vpop.f32.mrb[6].mxu0  ;;  %v1010_v4 = vpop.f32.mrb[11].mxu1 }
 0x461   :  { %v923_v7 = vpop.f32.mrb[7].mxu0  ;;  %1785 = vmatprep.mubr.msk.f32.mxu0 %vm352_vm1, %v1010_v4 }
 0x462   :  { %1786 = vmatmul.mubr.msk.f32.vlgmr.msra.gmra.mrb[10].mxu0 %vm352_vm1, %v1768_v5 }
 0x463   :  { %1790 = vmatprep.mubr.msk.f32.mxu0 %vm352_vm1, %v923_v7  ;;  %1789 = vmatpush3.msra.mxu0 %v1193_v3 }
 0x464   :  { %v1775_v28 = vpop.f32.mrb[8].mxu0  ;;  %1793 = vmatprep.subr.mxu0 %v1608_v31 }
 0x465   :  { %v1097_v8 = vpop.f32.mrb[9].mxu0 }
 0x46a   :  { %1791 = vmatmul.mubr.msk.f32.vlgmr.msra.gmra.mrb[10].mxu0 %vm352_vm1, %v1761_v6 }
 0x46b   :  { %1795 = vmatprep.mubr.msk.f32.mxu0 %vm352_vm1, %v1097_v8  ;;  %1794 = vmatpush3.msra.mxu0 %v1608_v31 }
 0x46c   :  { %1798 = vmatprep.subr.mxu0 %v1611_v9 }
 0x472   :  { %1796 = vmatmul.mubr.msk.f32.vlgmr.msra.gmra.mrb[10].mxu0 %vm352_vm1, %v1775_v28 }
 0x473   :  { %1799 = vmatpush3.msra.mxu0 %v1611_v9 }
 0x495   :  { %v1782_v10 = vpop.f32.mrb[12].mxu1 }
 0x496   :  { %v1184_v11 = vpop.f32.mrb[13].mxu1 }
 0x497   :  { %1800 = vmatprep.mubr.msk.f32.mxu0 %vm352_vm1, %v1184_v11 }
 0x498   :  { %1801 = vmatmul.mubr.msk.f32.vlgmr.msra.gmra.mrb[10].mxu0 %vm352_vm1, %v1782_v10 }
 0x499   :  { %1970 = shalt.err (!%p1967_p4)
}
 0x49a   :  { %s1971_s16 = scalar_lea.hbm %s2297_s5, 1024 }
 0x49b   :  { %p1972_p5 = scmp.ne.s32.totalorder %s2297_s5, %s1971_s16  ;;  %p1975_p6 = scmp.lt.u32.totalorder %s1971_s16, %s2297_s5 }
 0x49d   :  { %p1977_p7 = pnand %p1975_p6, %p1972_p5 }
 0x49f   :  { %1980 = shalt.err (!%p1977_p7)
}
 0x4a0   :  { %s2010_s21 = smov 128   ;;  %s2011_s22 = smov 8   ;;  %v1614_v12 = vld [vmem:[%s2295_s3] ss:$0 sm:$0xff] }
 0x4a1   :  { %1562 = dma.vmem_to_hbm [thread:$0]  %s1557_s13, 1024, %s2297_s5, [#allocation5], %s2010_s21, %s2010_s21, %s2011_s22  }
 0x4a2   :  { %s2012_s26 = smov [#allocation2]  }
 0x4a3   :  { %s1544_s27 = sshll.u32 %s2012_s26, 4  ;;  %s1545_s27 = int_to_ptr.vmem [resolvable:$true] %s1544_s27 }
 0x4a4   :  { %s1981_s1 = scalar_lea.vmem %s1545_s27, 256  ;;  %p1986_p9 = scmp.lt.s32.totalorder %s1545_s27, %s1545_s27 }
 0x4a5   :  { %p1982_p8 = scmp.ne.s32.totalorder %s1545_s27, %s1981_s1  ;;  %p1987_p10 = scmp.lt.s32.totalorder %s1981_s1, %s1981_s1 }
 0x4a7   :  { %p1988_p11 = por %p1987_p10, %p1986_p9 }
 0x4a9   :  { %p1989_p12 = pnand %p1988_p11, %p1982_p8 }
 0x56b   :  { %v1802_v13 = vpop.f32.mrb[10].mxu0 }
 0x56c   :  { %v1536_v14 = vadd.f32 %v1802_v13, %v1614_v12  ;;  %v1517_v15 = vpop.f32.mrb[11].mxu0 }
 0x56d   :  { %v1535_v16 = vadd.f32 %v1614_v12, %v1517_v15 }
 0x56e   :  { %1538 = vst.msk [vmem:[#allocation2 + $0x8] sm:$0xff] %vm39_vm0, %v1536_v14 }
 0x56f   :  { %1537 = vst.msk [vmem:[#allocation2] sm:$0xff] %vm39_vm0, %v1535_v16 }
 0x570   :  { %1992 = shalt.err (!%p1989_p12)
}
 0x571   :  { %s1993_s28 = scalar_lea.hbm %s2296_s4, 256 }
 0x572   :  { %p1994_p13 = scmp.ne.s32.totalorder %s2296_s4, %s1993_s28  ;;  %p1997_p0 = scmp.lt.u32.totalorder %s1993_s28, %s2296_s4 }
 0x574   :  { %p1999_p1 = pnand %p1997_p0, %p1994_p13 }
 0x576   :  { %2002 = shalt.err (!%p1999_p1)
}
 0x577   :  { %1550 = dma.vmem_to_hbm [thread:$0]  %s1545_s27, 256, %s2296_s4, [#allocation3], %s2010_s21, %s2010_s21, %s2011_s22  }
 0x578   :  { %2003 = dma.done.wait [#allocation3], 256  }
 0x579   :  { %2004 = vsyncadd [#allocation3], 4294967040 }
 0x57a   :  { %2005 = dma.done.wait [#allocation5], 1024  }
 0x57b   :  { %2006 = vsyncadd [#allocation5], 4294966272 }
 0x57c   :  { %1569 = vsyncpa [#allocation3], 1 }
 0x57d   :  { %1570 = vsyncpa [#allocation5], 1 }

</bundles_post_ra>
